<compile_context>
chip_gen: v6e
topology: v6e:2x2x1
jax: 0.10.0
libtpu: 0.0.40
codegen_flags: <defaults>
</compile_context>

<pallas_src>
import jax
import jax.numpy as jnp
from jax.experimental import pallas as pl
from jax.experimental.pallas import tpu as pltpu


def _round_up(x, m):
    return (x + m - 1) // m * m


def generator_kernel(x_ref, w_ref, b_ref, o_ref, m_ref, l_ref):
    """One (row-tile i, vocab-tile j) step of linear + online log-softmax.

    x_ref: (tm, d_model)  bf16  -- row tile of activations
    w_ref: (d_model, tn)  bf16  -- vocab tile of transposed weight
    b_ref: (1, tn)        f32   -- vocab tile of bias (padded cols = -1e30)
    o_ref: (tm, vocab_p)  f32   -- output slab, resident across the j axis
    m_ref, l_ref: (tm, 1) f32   -- running max / running sum(exp) scratch
    """
    j = pl.program_id(1)
    nj = pl.num_programs(1)
    tn = w_ref.shape[1]

    @pl.when(j == 0)
    def _init():
        m_ref[...] = jnp.full_like(m_ref, -jnp.inf)
        l_ref[...] = jnp.zeros_like(l_ref)

    # MXU matmul: bf16 inputs, f32 accumulation; bias added in f32.
    logits = jnp.dot(x_ref[...], w_ref[...], preferred_element_type=jnp.float32)
    logits = logits + b_ref[...]                       # (tm, tn) f32

    # Stash raw logits into the resident output slab (128-aligned lane offset).
    col = pl.multiple_of(j * tn, tn)
    o_ref[:, pl.ds(col, tn)] = logits

    # Online max / sum-exp update across vocab tiles (numerically stable).
    tile_max = jnp.max(logits, axis=-1, keepdims=True)
    m_new = jnp.maximum(m_ref[...], tile_max)
    l_ref[...] = (l_ref[...] * jnp.exp(m_ref[...] - m_new)
                  + jnp.sum(jnp.exp(logits - m_new), axis=-1, keepdims=True))
    m_ref[...] = m_new

    @pl.when(j == nj - 1)
    def _finalize():
        lse = m_ref[...] + jnp.log(l_ref[...])         # (tm, 1)
        o_ref[...] = o_ref[...] - lse                  # log_softmax = logit - lse


def generator_forward(x, weight_t, bias, *, tm=256, tn=512):
    """log_softmax(x @ weight_t + bias, axis=-1), matching nn.Linear + F.log_softmax.

    x:        (batch, seq, d_model) float
    weight_t: (d_model, vocab)  -- torch weight (vocab, d_model) transposed
    bias:     (vocab,)
    """
    b, s, d_model = x.shape
    vocab = weight_t.shape[1]
    rows = b * s

    # Clamp tiles for tiny inputs; pad rows/vocab so any shape works with large tiles.
    tm_eff = min(tm, _round_up(rows, 16))      # bf16 sublane granularity
    tn_eff = min(tn, _round_up(vocab, 128))    # lane granularity
    rows_p = _round_up(rows, tm_eff)
    vocab_p = _round_up(vocab, tn_eff)

    # bf16 matmul operands; bias stays f32.  Padded vocab columns get a huge
    # negative bias so they contribute exp(.)=0 to the lse and never perturb it.
    x2d = jnp.zeros((rows_p, d_model), jnp.bfloat16).at[:rows].set(
        x.reshape(rows, d_model).astype(jnp.bfloat16))
    w_p = jnp.zeros((d_model, vocab_p), jnp.bfloat16).at[:, :vocab].set(
        weight_t.astype(jnp.bfloat16))
    b_p = jnp.full((1, vocab_p), -1e30, jnp.float32).at[0, :vocab].set(
        bias.astype(jnp.float32))

    grid = (rows_p // tm_eff, vocab_p // tn_eff)

    # VMEM budget: resident f32 output slab (+writeback buffer) + double-buffered
    # bf16 x / weight tiles + bias tiles + scratch.  Cap by physical VMEM so the
    # same code works on v5e/v6e (128 MiB) and v7x (64 MiB).
    vmem_needed = (
        2 * tm_eff * vocab_p * 4
        + 2 * tm_eff * d_model * 2
        + 2 * d_model * tn_eff * 2
        + 2 * tn_eff * 4
        + 2 * tm_eff * 4
    )
    try:
        vmem_cap = pltpu.get_tpu_info().vmem_capacity_bytes
    except Exception:
        vmem_cap = 64 << 20  # conservative (v7x per-TC)
    vmem_limit = min(max(int(vmem_needed * 1.25) + (4 << 20), 32 << 20),
                     int(vmem_cap * 0.75))

    out2d = pl.pallas_call(
        generator_kernel,
        out_shape=jax.ShapeDtypeStruct((rows_p, vocab_p), jnp.float32),
        grid_spec=pltpu.PrefetchScalarGridSpec(
            num_scalar_prefetch=0,
            grid=grid,
            in_specs=[
                pl.BlockSpec((tm_eff, d_model), lambda i, j: (i, 0)),   # x row tile
                pl.BlockSpec((d_model, tn_eff), lambda i, j: (0, j)),   # weight vocab tile
                pl.BlockSpec((1, tn_eff), lambda i, j: (0, j)),         # bias vocab tile
            ],
            out_specs=pl.BlockSpec((tm_eff, vocab_p), lambda i, j: (i, 0)),
            scratch_shapes=[
                pltpu.VMEM((tm_eff, 1), jnp.float32),   # running max
                pltpu.VMEM((tm_eff, 1), jnp.float32),   # running sum(exp)
            ],
        ),
        compiler_params=pltpu.CompilerParams(
            dimension_semantics=("parallel", "arbitrary"),
            vmem_limit_bytes=vmem_limit,
        ),
    )(x2d, w_p, b_p)

    return out2d[:rows, :vocab].reshape(b, s, vocab)


if __name__ == "__main__":
    # Small shapes consistent with the module's forward.
    batch, seq, d_model, vocab = 2, 8, 32, 128

    key = jax.random.PRNGKey(0)
    kx, kw, kb = jax.random.split(key, 3)

    x = jax.random.normal(kx, (batch, seq, d_model), dtype=jnp.float32)
    # Deterministic init mimicking nn.Linear's uniform(-1/sqrt(d_model), 1/sqrt(d_model)).
    bound = 1.0 / (d_model ** 0.5)
    weight = jax.random.uniform(kw, (vocab, d_model), minval=-bound, maxval=bound,
                                dtype=jnp.float32)  # torch layout (out, in)
    bias = jax.random.uniform(kb, (vocab,), minval=-bound, maxval=bound,
                              dtype=jnp.float32)

    weight_t = weight.T  # (d_model, vocab) for x @ W

    out = generator_forward(x, weight_t, bias)
    out = jax.block_until_ready(out)

    # Reference using the same bf16-matmul / f32-accumulate precision as the kernel.
    logits_ref = (jnp.dot(x.reshape(-1, d_model).astype(jnp.bfloat16),
                          weight_t.astype(jnp.bfloat16),
                          preferred_element_type=jnp.float32)
                  + bias)
    ref = jax.nn.log_softmax(logits_ref, axis=-1).reshape(batch, seq, vocab)

    assert out.shape == (batch, seq, vocab)
    assert jnp.allclose(out, ref, atol=1e-2, rtol=1e-2), \
        float(jnp.max(jnp.abs(out - ref)))

    print("KERNEL_OK")
</pallas_src>

<mosaic_0001>
module attributes {stable_mosaic.version = 11 : i64} {
  func.func @generator_kernel(%arg0: i32, %arg1: i32, %arg2: memref<16x32xbf16, #tpu.memory_space<vmem>>, %arg3: memref<32x128xbf16, #tpu.memory_space<vmem>>, %arg4: memref<1x128xf32, #tpu.memory_space<vmem>>, %arg5: memref<16x128xf32, #tpu.memory_space<vmem>>, %arg6: memref<16x1xf32, #tpu.memory_space<vmem>>, %arg7: memref<16x1xf32, #tpu.memory_space<vmem>>) attributes {dimension_semantics = [#tpu.dimension_semantics<parallel>, #tpu.dimension_semantics<arbitrary>], iteration_bounds = array<i64: 1, 1>, scalar_prefetch = 0 : i64, scratch_operands = 2 : i64, tpu.core_type = #tpu.core_type<tc>, window_params = [{transform_indices = @transform_0, window_bounds = array<i64: 16, 32>}, {transform_indices = @transform_1, window_bounds = array<i64: 32, 128>}, {transform_indices = @transform_2, window_bounds = array<i64: 1, 128>}, {transform_indices = @transform_3, window_bounds = array<i64: 16, 128>}]} {
    %c0_i32 = arith.constant 0 : i32
    %0 = arith.cmpi eq, %arg1, %c0_i32 : i32
    %1 = arith.extui %0 : i1 to i32
    %c0_i32_0 = arith.constant 0 : i32
    %2 = arith.cmpi ne, %1, %c0_i32_0 : i32
    scf.if %2 {
      %cst_21 = arith.constant 0xFF800000 : f32
      %33 = vector.broadcast %cst_21 : f32 to vector<16x1xf32>
      %c0_22 = arith.constant 0 : index
      %c0_23 = arith.constant 0 : index
      %34 = vector.load %arg6[%c0_22, %c0_23] : memref<16x1xf32, #tpu.memory_space<vmem>>, vector<16x1xf32>
      tpu.vector_store %arg6[%c0_22, %c0_23], %33 {strides = array<i32>} : memref<16x1xf32, #tpu.memory_space<vmem>>, vector<16x1xf32>,
      %cst_24 = arith.constant 0.000000e+00 : f32
      %35 = vector.broadcast %cst_24 : f32 to vector<16x1xf32>
      %c0_25 = arith.constant 0 : index
      %c0_26 = arith.constant 0 : index
      %36 = vector.load %arg7[%c0_25, %c0_26] : memref<16x1xf32, #tpu.memory_space<vmem>>, vector<16x1xf32>
      tpu.vector_store %arg7[%c0_25, %c0_26], %35 {strides = array<i32>} : memref<16x1xf32, #tpu.memory_space<vmem>>, vector<16x1xf32>,
    } else {
    }
    %c0 = arith.constant 0 : index
    %c0_1 = arith.constant 0 : index
    %3 = vector.load %arg2[%c0, %c0_1] : memref<16x32xbf16, #tpu.memory_space<vmem>>, vector<16x32xbf16>
    %c0_2 = arith.constant 0 : index
    %c0_3 = arith.constant 0 : index
    %4 = vector.load %arg3[%c0_2, %c0_3] : memref<32x128xbf16, #tpu.memory_space<vmem>>, vector<32x128xbf16>
    %cst = arith.constant dense<0.000000e+00> : vector<16x128xf32>
    %5 = tpu.matmul %3, %4, %cst {dimension_numbers = #tpu.dot_dimension_numbers<[1], [0], [0], [1], [0, 0, 1, 1], [], []>} : vector<16x32xbf16>, vector<32x128xbf16>, vector<16x128xf32> -> vector<16x128xf32>
    %c0_4 = arith.constant 0 : index
    %c0_5 = arith.constant 0 : index
    %6 = vector.load %arg4[%c0_4, %c0_5] : memref<1x128xf32, #tpu.memory_space<vmem>>, vector<1x128xf32>
    %7 = vector.broadcast %6 : vector<1x128xf32> to vector<16x128xf32>
    %8 = arith.addf %5, %7 : vector<16x128xf32>
    %c128_i32 = arith.constant 128 : i32
    %9 = arith.muli %arg1, %c128_i32 : i32
    %10 = tpu.assume_multiple %9, 128 : i32
    %c0_6 = arith.constant 0 : index
    %11 = arith.index_cast %10 : i32 to index
    %12 = vector.load %arg5[%c0_6, %11] : memref<16x128xf32, #tpu.memory_space<vmem>>, vector<16x128xf32>
    tpu.vector_store %arg5[%c0_6, %11], %8 {strides = array<i32>} : memref<16x128xf32, #tpu.memory_space<vmem>>, vector<16x128xf32>,
    %cst_7 = arith.constant dense<0xFF800000> : vector<16xf32>
    %13 = vector.multi_reduction <maximumf>, %8, %cst_7 [1] : vector<16x128xf32> to vector<16xf32>
    %14 = vector.shape_cast %13 : vector<16xf32> to vector<16x1xf32>
    %c0_8 = arith.constant 0 : index
    %c0_9 = arith.constant 0 : index
    %15 = vector.load %arg6[%c0_8, %c0_9] : memref<16x1xf32, #tpu.memory_space<vmem>>, vector<16x1xf32>
    %16 = arith.maximumf %15, %14 : vector<16x1xf32>
    %c0_10 = arith.constant 0 : index
    %c0_11 = arith.constant 0 : index
    %17 = vector.load %arg7[%c0_10, %c0_11] : memref<16x1xf32, #tpu.memory_space<vmem>>, vector<16x1xf32>
    %c0_12 = arith.constant 0 : index
    %c0_13 = arith.constant 0 : index
    %18 = vector.load %arg6[%c0_12, %c0_13] : memref<16x1xf32, #tpu.memory_space<vmem>>, vector<16x1xf32>
    %19 = arith.subf %18, %16 : vector<16x1xf32>
    %20 = math.exp %19 : vector<16x1xf32>
    %21 = arith.mulf %17, %20 : vector<16x1xf32>
    %22 = vector.broadcast %16 : vector<16x1xf32> to vector<16x128xf32>
    %23 = arith.subf %8, %22 : vector<16x128xf32>
    %24 = math.exp %23 : vector<16x128xf32>
    %cst_14 = arith.constant dense<0.000000e+00> : vector<16xf32>
    %25 = vector.multi_reduction <add>, %24, %cst_14 [1] : vector<16x128xf32> to vector<16xf32>
    %26 = vector.shape_cast %25 : vector<16xf32> to vector<16x1xf32>
    %27 = arith.addf %21, %26 : vector<16x1xf32>
    %c0_15 = arith.constant 0 : index
    %c0_16 = arith.constant 0 : index
    %28 = vector.load %arg7[%c0_15, %c0_16] : memref<16x1xf32, #tpu.memory_space<vmem>>, vector<16x1xf32>
    tpu.vector_store %arg7[%c0_15, %c0_16], %27 {strides = array<i32>} : memref<16x1xf32, #tpu.memory_space<vmem>>, vector<16x1xf32>,
    %c0_17 = arith.constant 0 : index
    %c0_18 = arith.constant 0 : index
    %29 = vector.load %arg6[%c0_17, %c0_18] : memref<16x1xf32, #tpu.memory_space<vmem>>, vector<16x1xf32>
    tpu.vector_store %arg6[%c0_17, %c0_18], %16 {strides = array<i32>} : memref<16x1xf32, #tpu.memory_space<vmem>>, vector<16x1xf32>,
    %c0_i32_19 = arith.constant 0 : i32
    %30 = arith.cmpi eq, %arg1, %c0_i32_19 : i32
    %31 = arith.extui %30 : i1 to i32
    %c0_i32_20 = arith.constant 0 : i32
    %32 = arith.cmpi ne, %31, %c0_i32_20 : i32
    scf.if %32 {
      %c0_21 = arith.constant 0 : index
      %c0_22 = arith.constant 0 : index
      %33 = vector.load %arg6[%c0_21, %c0_22] : memref<16x1xf32, #tpu.memory_space<vmem>>, vector<16x1xf32>
      %c0_23 = arith.constant 0 : index
      %c0_24 = arith.constant 0 : index
      %34 = vector.load %arg7[%c0_23, %c0_24] : memref<16x1xf32, #tpu.memory_space<vmem>>, vector<16x1xf32>
      %35 = math.log %34 : vector<16x1xf32>
      %36 = arith.addf %33, %35 : vector<16x1xf32>
      %c0_25 = arith.constant 0 : index
      %c0_26 = arith.constant 0 : index
      %37 = vector.load %arg5[%c0_25, %c0_26] : memref<16x128xf32, #tpu.memory_space<vmem>>, vector<16x128xf32>
      %38 = vector.broadcast %36 : vector<16x1xf32> to vector<16x128xf32>
      %39 = arith.subf %37, %38 : vector<16x128xf32>
      %c0_27 = arith.constant 0 : index
      %c0_28 = arith.constant 0 : index
      %40 = vector.load %arg5[%c0_27, %c0_28] : memref<16x128xf32, #tpu.memory_space<vmem>>, vector<16x128xf32>
      tpu.vector_store %arg5[%c0_27, %c0_28], %39 {strides = array<i32>} : memref<16x128xf32, #tpu.memory_space<vmem>>, vector<16x128xf32>,
    } else {
    }
    return
  }
  func.func @transform_0(%arg0: i32, %arg1: i32) -> (i32, i32) {
    %c0_i32 = arith.constant 0 : i32
    %c0_i32_0 = arith.constant 0 : i32
    return %arg0, %c0_i32 : i32, i32
  }
  func.func @transform_1(%arg0: i32, %arg1: i32) -> (i32, i32) {
    %c0_i32 = arith.constant 0 : i32
    %c0_i32_0 = arith.constant 0 : i32
    return %c0_i32, %arg1 : i32, i32
  }
  func.func @transform_2(%arg0: i32, %arg1: i32) -> (i32, i32) {
    %c0_i32 = arith.constant 0 : i32
    %c0_i32_0 = arith.constant 0 : i32
    return %c0_i32, %arg1 : i32, i32
  }
  func.func @transform_3(%arg0: i32, %arg1: i32) -> (i32, i32) {
    %c0_i32 = arith.constant 0 : i32
    %c0_i32_0 = arith.constant 0 : i32
    return %arg0, %c0_i32 : i32, i32
  }
}

</mosaic_0001>

<bundles_post_ra>
// kernel: tpu_custom_call.1
= control target key start
LH: loop header
LB: loop body
LE: loop exit
PB: predicated region body
PF: predicated region fallthrough
CT: control target
= control target key end

     0   :  { %8 = vsyncpa [#allocation5], 0  ;;  %s398_s0 = inlined_call_operand.hbm [shape: bf16[16,32], index: 0, kind: input, shape index: {}]   ;;  %s399_s1 = inlined_call_operand.hbm [shape: bf16[32,128], index: 1, kind: input, shape index: {}]   ;;  %s400_s2 = inlined_call_operand.vmem [shape: f32[1,128], index: 2, kind: input, shape index: {}]   ;;  %s401_s3 = inlined_call_operand.hbm [shape: f32[16,128], index: 3, kind: output, shape index: {}]  }
   0x1   :  { %9 = vsyncpa [#allocation8], 0 }
   0x2   :  { %10 = vsyncpa [#allocation6], 0  ;;  %s337_s12 = smov [#allocation4]  }
   0x3   :  { %s16_s13 = sshll.u32 %s337_s12, 4  ;;  %s17_s13 = int_to_ptr.vmem [resolvable:$true] %s16_s13 }
   0x4   :  { %s279_s14 = scalar_lea.vmem %s17_s13, 128  ;;  %p284_p1 = scmp.lt.s32.totalorder %s17_s13, %s17_s13 }
   0x5   :  { %p280_p0 = scmp.ne.s32.totalorder %s17_s13, %s279_s14  ;;  %p285_p2 = scmp.lt.s32.totalorder %s279_s14, %s279_s14 }
   0x7   :  { %p286_p3 = por %p285_p2, %p284_p1 }
   0x9   :  { %p287_p4 = pnand %p286_p3, %p280_p0 }
   0xb   :  { %290 = shalt.err (!%p287_p4)
}
   0xc   :  { %s338_s15 = smov 64   ;;  %s339_s16 = smov 4  }
   0xd   :  { %22 = dma.hbm_to_vmem [thread:$0]  %s398_s0, 128, %s17_s13, [#allocation5], %s338_s15, %s338_s15, %s339_s16  }
   0xe   :  { %s340_s19 = smov [#allocation7]  }
   0xf   :  { %s28_s20 = sshll.u32 %s340_s19, 4  ;;  %s29_s20 = int_to_ptr.vmem [resolvable:$true] %s28_s20 }
  0x10   :  { %s299_s21 = scalar_lea.vmem %s29_s20, 256  ;;  %p304_p6 = scmp.lt.s32.totalorder %s29_s20, %s29_s20 }
  0x11   :  { %p300_p5 = scmp.ne.s32.totalorder %s29_s20, %s299_s21  ;;  %p305_p7 = scmp.lt.s32.totalorder %s299_s21, %s299_s21 }
  0x13   :  { %p306_p8 = por %p305_p7, %p304_p6 }
  0x15   :  { %p307_p9 = pnand %p306_p8, %p300_p5 }
  0x17   :  { %310 = shalt.err (!%p307_p9)
}
  0x18   :  { %34 = dma.hbm_to_vmem [thread:$0]  %s399_s1, 256, %s29_s20, [#allocation8], %s338_s15, %s338_s15, %s339_s16  }
  0x19   :  { %331 = dma.done.wait [#allocation5], 128  }
  0x1a   :  { %332 = vsyncadd [#allocation5], 4294967168 }
  0x1b   :  { %333 = dma.done.wait [#allocation8], 256  }
  0x1c   :  { %334 = vsyncadd [#allocation8], 4294967040  ;;  %vm48_vm0 = vcmask 7168   ;;  %v341_v0 = vmov 0.0   ;;  %vm342_vm1 = vmmov 0   ;;  %v256_v1 = vld [vmem:[#allocation7 + $0x8] sm:$0xff]  }
  0x1d   :  { %51 = vst.msk [vmem:[#allocation3] sm:$0xff] %vm48_vm0, %v341_v0  ;;  %52 = vst.msk [vmem:[#allocation3 + $0x8] sm:$0xff] %vm48_vm0, %v341_v0  ;;  %235 = vmatprep.subr.bf16.mxu0 %v341_v0  ;;  %239 = vmatprep.mubr.msk.bf16.mxu0 %vm342_vm1, %v341_v0  ;;  %v257_v2 = vld [vmem:[#allocation7] sm:$0xff]   ;;  %v258_v3 = vld [vmem:[#allocation4] sm:$0xff]   ;;  %vm83_vm2 = vcmask 261120   ;;  %v343_v4 = vmov -inf  }
  0x1e   :  { %236 = vmatpush3.bf16.msra.mxu0 %v256_v1  ;;  %49 = vst.msk [vmem:[#allocation2] sm:$0xff] %vm48_vm0, %v343_v4  ;;  %50 = vst.msk [vmem:[#allocation2 + $0x8] sm:$0xff] %vm48_vm0, %v343_v4  ;;  %v227_v5 = vld [vmem:[%s400_s2] ss:$0 sm:$0xff]  ;;  %v344_v12 = vmov 0   ;;  %s345_s2 = smov [#allocation9]  }
  0x1f   :  { %237 = vmatprep.subr.bf16.mxu0 %v341_v0  ;;  %254 = vset.pattern.permute.xlu1 %v344_v12  ;;  %s213_s24 = sshll.u32 %s345_s2, 4  ;;  %s214_s24 = int_to_ptr.vmem [resolvable:$true] %s213_s24 }
  0x20   :  { %255 = vset.pattern.permute.xlu0 %v344_v12  ;;  %s311_s25 = scalar_lea.vmem %s214_s24, 256  ;;  %p316_p11 = scmp.lt.s32.totalorder %s214_s24, %s214_s24 }
  0x21   :  { %p312_p10 = scmp.ne.s32.totalorder %s214_s24, %s311_s25  ;;  %p317_p12 = scmp.lt.s32.totalorder %s311_s25, %s311_s25 }
  0x22   :  { %238 = vmatpush3.bf16.msra.mxu0 %v257_v2 }
  0x23   :  { %p318_p13 = por %p317_p12, %p316_p11 }
  0x24   :  { %v142_v32 = vld [vmem:[#allocation3] sm:$0xff]  ;;  %v143_v36 = vld [vmem:[#allocation3 + $0x8] sm:$0xff] }
  0x25   :  { %240 = vmatmul.mubr.msk.bf16.vlgmr.msra.gmra.mxu0 %vm83_vm2, %v258_v3  ;;  %v138_v13 = vld [vmem:[#allocation2] sm:$0xff]  ;;  %v139_v16 = vld [vmem:[#allocation2 + $0x8] sm:$0xff]  ;;  %p319_p0 = pnand %p318_p13, %p312_p10 }
  0xe5   :  { %v121_v6 = vpop.f32.mrf.mxu0 }
  0xe6   :  { %v381_v7 = vadd.f32 %v227_v5, %v121_v6 }
  0xe7   :  { %v241_v8 = vpop.f32.mrf.mxu0 }
  0xe8   :  { %134 = vmax.xlane.f32.xlu0 %v381_v7 }
  0xe9   :  { %v124_v9 = vpop.f32.mrf.mxu0 }
  0xea   :  { %v384_v10 = vadd.f32 %v227_v5, %v124_v9 }
  0xeb   :  { %v242_v11 = vpop.f32.mrf.mxu0 }
  0xec   :  { %136 = vmax.xlane.f32.xlu0 %v384_v10 }
 0x171   :  { %v135_v14 = vpop.xlane.xlu0 %134 }
 0x172   :  { %v140_v15 = vmax.f32 %v138_v13, %v135_v14 }
 0x174   :  { %v144_v17 = vsub.f32 %v138_v13, %v140_v15  ;;  %177 = vst.msk [vmem:[#allocation2] sm:$0xff] %vm48_vm0, %v140_v15  ;;  %154 = vperm.xlu1 %254, %v140_v15  }
 0x175   :  { %v137_v18 = vpop.xlane.xlu0 %136 }
 0x176   :  { %v141_v19 = vmax.f32 %v139_v16, %v137_v18  ;;  %v146_v29 = vmul.f32 1.442695, %v144_v17 }
 0x178   :  { %v145_v20 = vsub.f32 %v139_v16, %v141_v19  ;;  %178 = vst.msk [vmem:[#allocation2 + $0x8] sm:$0xff] %vm48_vm0, %v141_v19  ;;  %159 = vperm.xlu1 %254, %v141_v19  }
 0x17a   :  { %v148_v30 = vmul.f32 1.442695, %v145_v20 }
 0x17b   :  { %v182_v45 = vld [vmem:[#allocation2] sm:$0xff] }
 0x17f   :  { %v183_v49 = vld [vmem:[#allocation2 + $0x8] sm:$0xff] }
 0x1ef   :  { %v155_v21 = vpop.permute.xlu1 %154 }
 0x1f0   :  { %v162_v22 = vsub.f32 %v381_v7, %v155_v21 }
 0x1f2   :  { %v164_v23 = vmul.f32 1.442695, %v162_v22 }
 0x1f3   :  { %v160_v24 = vpop.permute.xlu1 %159 }
 0x1f4   :  { %259 = vpow2.f32 %v164_v23  ;;  %v163_v25 = vsub.f32 %v384_v10, %v160_v24 }
 0x1f6   :  { %v166_v26 = vmul.f32 1.442695, %v163_v25 }
 0x1f8   :  { %261 = vpow2.f32 %v166_v26 }
 0x1f9   :  { %263 = vpow2.f32 %v146_v29 }
 0x1fa   :  { %265 = vpow2.f32 %v148_v30 }
 0x201   :  { %v260_v27 = vpop.eup %259 }
 0x202   :  { %168 = vadd.xlane.f32.xlu0 %v260_v27 }
 0x205   :  { %v262_v28 = vpop.eup %261 }
 0x206   :  { %170 = vadd.xlane.f32.xlu1 %v262_v28  ;;  %v264_v31 = vpop.eup %263 }
 0x207   :  { %v150_v33 = vmul.f32 %v264_v31, %v142_v32  ;;  %v266_v34 = vpop.eup %265 }
 0x208   :  { %v151_v38 = vmul.f32 %v266_v34, %v143_v36 }
 0x28b   :  { %v169_v35 = vpop.xlane.xlu0 %168 }
 0x28c   :  { %v172_v37 = vadd.f32 %v169_v35, %v150_v33 }
 0x28e   :  { %175 = vst.msk [vmem:[#allocation3] sm:$0xff] %vm48_vm0, %v172_v37 }
 0x28f   :  { %v171_v39 = vpop.xlane.xlu1 %170 }
 0x290   :  { %v173_v40 = vadd.f32 %v171_v39, %v151_v38 }
 0x292   :  { %176 = vst.msk [vmem:[#allocation3 + $0x8] sm:$0xff] %vm48_vm0, %v173_v40 }
 0x295   :  { %v184_v41 = vld [vmem:[#allocation3] sm:$0xff] }
 0x296   :  { %267 = vlog2.f32 %v184_v41 }
 0x299   :  { %v185_v42 = vld [vmem:[#allocation3 + $0x8] sm:$0xff] }
 0x29a   :  { %269 = vlog2.f32 %v185_v42 }
 0x2a3   :  { %v268_v43 = vpop.eup %267 }
 0x2a4   :  { %v187_v44 = vmul.f32 0.6931472, %v268_v43 }
 0x2a6   :  { %v190_v46 = vadd.f32 %v187_v44, %v182_v45 }
 0x2a7   :  { %v270_v47 = vpop.eup %269 }
 0x2a8   :  { %196 = vperm.xlu0 %255, %v190_v46   ;;  %v189_v48 = vmul.f32 0.6931472, %v270_v47 }
 0x2aa   :  { %v191_v50 = vadd.f32 %v189_v48, %v183_v49 }
 0x2ac   :  { %201 = vperm.xlu1 %254, %v191_v50  }
 0x323   :  { %v197_v51 = vpop.permute.xlu0 %196 }
 0x324   :  { %v204_v52 = vsub.f32 %v381_v7, %v197_v51 }
 0x326   :  { %206 = vst [vmem:[#allocation9] sm:$0xff] %v204_v52 }
 0x327   :  { %v202_v53 = vpop.permute.xlu1 %201 }
 0x328   :  { %v205_v54 = vsub.f32 %v384_v10, %v202_v53 }
 0x32a   :  { %207 = vst [vmem:[#allocation9 + $0x8] sm:$0xff] %v205_v54 }
 0x32b   :  { %322 = shalt.err (!%p319_p0)
}
 0x32c   :  { %s346_s26 = smov 128   ;;  %s347_s27 = smov 8  }
 0x32d   :  { %219 = dma.vmem_to_hbm [thread:$0]  %s214_s24, 256, %s401_s3, [#allocation6], %s346_s26, %s346_s26, %s347_s27  }
 0x32e   :  { %335 = dma.done.wait [#allocation6], 256  }
 0x32f   :  { %336 = vsyncadd [#allocation6], 4294967040 }
 0x330   :  { %223 = vsyncpa [#allocation5], 1 }
 0x331   :  { %224 = vsyncpa [#allocation8], 1 }
 0x332   :  { %225 = vsyncpa [#allocation6], 1 }

</bundles_post_ra>
